<compile_context>
chip_gen: v5e
topology: v5e:2x2
jax: 0.10.0
libtpu: 0.0.40
codegen_flags: <defaults>
</compile_context>

<pallas_src>
import functools

import jax
import jax.numpy as jnp
from jax.experimental import pallas as pl
from jax.experimental.pallas import tpu as pltpu

_LANE = 128


def _round_up(n, m):
    return ((n + m - 1) // m) * m


def _row_align(dtype):
    # Sub-32-bit dtypes pack rows along sublanes: 8 rows (f32), 16 (bf16), 32 (int8/fp8).
    return max(8, 32 // jnp.dtype(dtype).itemsize)


def _device_kind():
    try:
        return jax.devices()[0].device_kind.lower()
    except Exception:
        return ""


def _num_tensorcores():
    """TensorCores reachable by one pallas_call via the 'parallel' grid axis."""
    kind = _device_kind()
    if any(tag in kind for tag in ("v4", "v5p", "7")):
        return 2
    return 1


def _vmem_capacity_bytes():
    """Best-effort physical VMEM per TensorCore."""
    try:
        info = pltpu.get_tpu_info()
        cap = getattr(info, "vmem_capacity_bytes", None)
        if cap:
            return int(cap)
    except Exception:
        pass
    kind = _device_kind()
    if "v5" in kind or "v6" in kind:
        return 128 << 20
    return 64 << 20  # conservative (v7x / unknown)


def _apply_activation(h, activation):
    if activation == "relu":
        return jnp.maximum(h, 0.0)
    elif activation == "sigmoid":
        # exp and reciprocal both go to the EUP slot (frees VALU slots vs a
        # f32 divide inside jax.nn.sigmoid); approx recip error ~1e-4 rel.
        return pl.reciprocal(1.0 + jnp.exp(-h), approx=True)
    elif activation == "tanh":
        return jnp.tanh(h)
    else:
        raise ValueError(f"unsupported activation: {activation}")


def _mlp_kernel(n_layer, activation, io_dtype, *refs):
    """Fused MLP: n_layer x (matmul + bias + activation) on one batch tile.

    refs = (x_ref, w0_ref, b0_ref, w1_ref, b1_ref, ..., out_ref)

    VMEM budget note: each layer holds a tb x out_pad f32 accumulator plus the
    previous h live (~2 * tb * max(out_pad) * 4 B), which spills from vregs to
    VMEM for realistic tiles; the wrapper budgets this when picking tb.
    """
    x_ref = refs[0]
    out_ref = refs[-1]
    h = x_ref[...]  # native dtype tile, fed directly to the MXU
    for i in range(n_layer):
        w_ref = refs[1 + 2 * i]
        b_ref = refs[2 + 2 * i]  # shape (1, out_pad)
        acc = jnp.dot(h, w_ref[...], preferred_element_type=jnp.float32)
        acc = acc + b_ref[...].astype(jnp.float32)
        acc = _apply_activation(acc, activation)
        if i < n_layer - 1:
            # Feed the next matmul in the I/O dtype (keeps bf16 MXU rate for
            # bf16 callers; no-op for f32).  Slight divergence from an f32
            # reference is expected for bf16 inputs.
            h = acc.astype(io_dtype)
        else:
            h = acc
    out_ref[...] = h.astype(out_ref.dtype)


def _choose_batch_tile(batch, row_align, max_tile, act_budget_bytes, per_row_bytes, num_tc):
    # Start from the requested maximum, row-aligned.
    tb = _round_up(min(max_tile, max(batch, 1)), row_align)
    # (a) fit the activation-tile VMEM budget (weights budgeted separately).
    while tb > row_align and tb * per_row_bytes > act_budget_bytes:
        tb -= row_align
    tb = max(tb, row_align)
    # (b) megacore: the "parallel" batch axis only shards across TensorCores
    #     if the grid has at least num_tc steps (matters on v7x).
    if num_tc > 1 and batch > row_align * (num_tc - 1):
        tb = min(tb, max(row_align, _round_up(pl.cdiv(batch, num_tc), row_align)))
    # (c) resize so the last tile isn't mostly padding
    #     (e.g. batch=130 with tb=128 would otherwise pad to 256 rows).
    n_tiles = pl.cdiv(batch, tb)
    tb = _round_up(pl.cdiv(batch, n_tiles), row_align)
    return tb


def neural_net_forward(x, weights, biases, activation, batch_tile=None):
    """Pallas implementation of NeuralNetModel.forward.

    x:       (batch, input_dim) array
    weights: list of (in_i, out_i) arrays
    biases:  list of (out_i,)     arrays
    """
    n_layer = len(weights)
    batch, input_dim = x.shape
    out_dim = weights[-1].shape[1]
    dtype = x.dtype
    itemsize = jnp.dtype(dtype).itemsize
    row_align = _row_align(dtype)

    # --- Lane-dense padding of all feature dims (once, in the wrapper) -----
    in_dims = [w.shape[0] for w in weights]
    out_dims = [w.shape[1] for w in weights]
    in_pad = [_round_up(d, _LANE) for d in in_dims]
    out_pad = [_round_up(d, _LANE) for d in out_dims]

    w_p, b_p = [], []
    for w, b, ip, op in zip(weights, biases, in_pad, out_pad):
        wp = jnp.zeros((ip, op), w.dtype).at[: w.shape[0], : w.shape[1]].set(w)
        bp = jnp.zeros((1, op), b.dtype).at[0, : b.shape[0]].set(b)
        w_p.append(wp)
        b_p.append(bp)

    # --- VMEM budgeting & batch-tile policy ---------------------------------
    num_tc = _num_tensorcores()
    vmem_cap = _vmem_capacity_bytes()
    if batch_tile is None:
        # Bigger tiles on single-TC 128 MiB chips (v5e/v6e); smaller on v7x
        # (half the VMEM, and the grid must have >= 2 steps to use both TCs).
        batch_tile = 256 if num_tc > 1 else 512

    weight_bytes = sum(w.nbytes + b.nbytes for w, b in zip(w_p, b_p))
    # Per-row cost of one batch tile: double-buffered x/out DMA blocks plus the
    # f32 accumulator + previous-h intermediates that spill to VMEM.
    per_row_bytes = 2 * itemsize * (in_pad[0] + out_pad[-1]) + 2 * 4 * max(out_pad)
    usable = int(0.8 * vmem_cap)  # ~20% headroom for compiler scratch
    act_budget = max(usable - weight_bytes, row_align * per_row_bytes)
    # TODO(synk): if weight_bytes alone approaches `usable` (f32 layer_size
    # ~2K on v7x at n_layer=3), add K/N tiling with an f32 VMEM accumulator and
    # pl.when init/finalize instead of keeping every layer fully resident.

    tb = _choose_batch_tile(batch, row_align, batch_tile, act_budget, per_row_bytes, num_tc)
    grid_n = pl.cdiv(batch, tb)
    batch_p = grid_n * tb

    x_p = jnp.zeros((batch_p, in_pad[0]), dtype).at[:batch, :input_dim].set(x)
    out_pad_dim = out_pad[-1]

    operands = [x_p]
    for w, b in zip(w_p, b_p):
        operands.append(w)
        operands.append(b)

    # Explicit scoped-VMEM limit: defaults (16/32 MiB) are far below physical.
    # Budget 2x weights so the double-buffered fallback path also fits.
    vmem_limit = int(
        min(0.9 * vmem_cap,
            max(32 << 20, 2 * weight_bytes + tb * per_row_bytes + (8 << 20)))
    )

    # Advisory cost estimate so XLA doesn't serialize around the custom call.
    flops = 2 * batch_p * sum(ip * op for ip, op in zip(in_pad, out_pad))
    transcendentals = 0 if activation == "relu" else batch_p * sum(out_pad)
    bytes_accessed = int(x_p.nbytes) + weight_bytes + batch_p * out_pad_dim * itemsize

    kernel = functools.partial(_mlp_kernel, n_layer, activation, dtype)

    def run(single_buffer_weights):
        in_specs = [pl.BlockSpec((tb, in_pad[0]), lambda i: (i, 0))]
        # weights / biases: whole-array blocks, constant index_map -> resident
        # across all batch tiles.  Single pipeline buffer (the second buffer of
        # a constant block is never used) halves resident weight footprint.
        for w, b in zip(w_p, b_p):
            if single_buffer_weights:
                in_specs.append(
                    pl.BlockSpec(w.shape, lambda i: (0, 0), pipeline_mode=pl.Buffered(1)))
                in_specs.append(
                    pl.BlockSpec(b.shape, lambda i: (0, 0), pipeline_mode=pl.Buffered(1)))
            else:
                in_specs.append(pl.BlockSpec(w.shape, lambda i: (0, 0)))
                in_specs.append(pl.BlockSpec(b.shape, lambda i: (0, 0)))
        out_spec = pl.BlockSpec((tb, out_pad_dim), lambda i: (i, 0))
        return pl.pallas_call(
            kernel,
            out_shape=jax.ShapeDtypeStruct((batch_p, out_pad_dim), dtype),
            grid_spec=pl.GridSpec(
                grid=(grid_n,),
                in_specs=in_specs,
                out_specs=out_spec,
            ),
            compiler_params=pltpu.CompilerParams(
                dimension_semantics=("parallel",),
                vmem_limit_bytes=vmem_limit,
            ),
            cost_estimate=pl.CostEstimate(
                flops=flops,
                transcendentals=transcendentals,
                bytes_accessed=bytes_accessed,
            ),
        )(*operands)

    try:
        out_padded = run(True)
    except Exception:
        # Fallback if pipeline_mode=pl.Buffered(1) is unsupported in this build:
        # identical semantics, default double-buffered (but never re-DMA'd) weights.
        out_padded = run(False)

    return out_padded[:batch, :out_dim]


def init_params(key, input_dim, output_dim, n_layer, layer_size):
    """Deterministic init matching nn.Linear's U(-1/sqrt(fan_in), 1/sqrt(fan_in))."""
    weights, biases = [], []
    for i in range(n_layer):
        in_size = input_dim if i == 0 else layer_size
        out_size = output_dim if i == n_layer - 1 else layer_size
        key, kw, kb = jax.random.split(key, 3)
        bound = 1.0 / jnp.sqrt(in_size)
        w = jax.random.uniform(
            kw, (in_size, out_size), jnp.float32, minval=-bound, maxval=bound
        )
        b = jax.random.uniform(
            kb, (out_size,), jnp.float32, minval=-bound, maxval=bound
        )
        weights.append(w)
        biases.append(b)
    return weights, biases


def _reference(x, weights, biases, activation):
    h = x
    for w, b in zip(weights, biases):
        h = h @ w + b
        if activation == "relu":
            h = jnp.maximum(h, 0.0)
        elif activation == "sigmoid":
            h = jax.nn.sigmoid(h)
        else:
            h = jnp.tanh(h)
    return h


if __name__ == "__main__":
    # Module config (small, forward-consistent shapes)
    input_dim = 16
    output_dim = 8
    n_layer = 3
    layer_size = 32
    batch = 8

    key = jax.random.PRNGKey(0)
    key, kx = jax.random.split(key)
    x = jax.random.normal(kx, (batch, input_dim), dtype=jnp.float32)
    weights, biases = init_params(key, input_dim, output_dim, n_layer, layer_size)

    # relu / tanh checked tightly; sigmoid uses the EUP approx reciprocal, so a
    # slightly looser tolerance applies.
    for activation, tol in (("relu", 1e-5), ("tanh", 1e-5), ("sigmoid", 5e-3)):
        out = neural_net_forward(x, weights, biases, activation)
        out = jax.block_until_ready(out)
        ref = _reference(x, weights, biases, activation)
        assert out.shape == (batch, output_dim)
        assert jnp.allclose(out, ref, atol=tol, rtol=tol), (
            f"mismatch vs reference for activation={activation}"
        )

    print("KERNEL_OK")
</pallas_src>

<mosaic_0001>
module attributes {stable_mosaic.version = 11 : i64} {
  func.func @_mlp_kernel(%arg0: i32, %arg1: memref<8x128xf32, #tpu.memory_space<vmem>>, %arg2: memref<128x128xf32, #tpu.memory_space<vmem>>, %arg3: memref<1x128xf32, #tpu.memory_space<vmem>>, %arg4: memref<128x128xf32, #tpu.memory_space<vmem>>, %arg5: memref<1x128xf32, #tpu.memory_space<vmem>>, %arg6: memref<128x128xf32, #tpu.memory_space<vmem>>, %arg7: memref<1x128xf32, #tpu.memory_space<vmem>>, %arg8: memref<8x128xf32, #tpu.memory_space<vmem>>) attributes {dimension_semantics = [#tpu.dimension_semantics<parallel>], iteration_bounds = array<i64: 1>, scalar_prefetch = 0 : i64, scratch_operands = 0 : i64, tpu.core_type = #tpu.core_type<tc>, window_params = [{transform_indices = @transform_0, window_bounds = array<i64: 8, 128>}, {pipeline_mode = #tpu.pipeline_mode<synchronous>, transform_indices = @transform_1, window_bounds = array<i64: 128, 128>}, {pipeline_mode = #tpu.pipeline_mode<synchronous>, transform_indices = @transform_2, window_bounds = array<i64: 1, 128>}, {pipeline_mode = #tpu.pipeline_mode<synchronous>, transform_indices = @transform_3, window_bounds = array<i64: 128, 128>}, {pipeline_mode = #tpu.pipeline_mode<synchronous>, transform_indices = @transform_4, window_bounds = array<i64: 1, 128>}, {pipeline_mode = #tpu.pipeline_mode<synchronous>, transform_indices = @transform_5, window_bounds = array<i64: 128, 128>}, {pipeline_mode = #tpu.pipeline_mode<synchronous>, transform_indices = @transform_6, window_bounds = array<i64: 1, 128>}, {transform_indices = @transform_7, window_bounds = array<i64: 8, 128>}]} {
    %c0 = arith.constant 0 : index
    %c0_0 = arith.constant 0 : index
    %0 = vector.load %arg1[%c0, %c0_0] : memref<8x128xf32, #tpu.memory_space<vmem>>, vector<8x128xf32>
    %c0_1 = arith.constant 0 : index
    %c0_2 = arith.constant 0 : index
    %1 = vector.load %arg2[%c0_1, %c0_2] : memref<128x128xf32, #tpu.memory_space<vmem>>, vector<128x128xf32>
    %cst = arith.constant dense<0.000000e+00> : vector<8x128xf32>
    %2 = tpu.matmul %0, %1, %cst {dimension_numbers = #tpu.dot_dimension_numbers<[1], [0], [0], [1], [0, 0, 1, 1], [], []>} : vector<8x128xf32>, vector<128x128xf32>, vector<8x128xf32> -> vector<8x128xf32>
    %c0_3 = arith.constant 0 : index
    %c0_4 = arith.constant 0 : index
    %3 = vector.load %arg3[%c0_3, %c0_4] : memref<1x128xf32, #tpu.memory_space<vmem>>, vector<1x128xf32>
    %4 = vector.broadcast %3 : vector<1x128xf32> to vector<8x128xf32>
    %5 = arith.addf %2, %4 : vector<8x128xf32>
    %cst_5 = arith.constant 0.000000e+00 : f32
    %6 = vector.broadcast %cst_5 : f32 to vector<8x128xf32>
    %7 = arith.maximumf %5, %6 : vector<8x128xf32>
    %c0_6 = arith.constant 0 : index
    %c0_7 = arith.constant 0 : index
    %8 = vector.load %arg4[%c0_6, %c0_7] : memref<128x128xf32, #tpu.memory_space<vmem>>, vector<128x128xf32>
    %cst_8 = arith.constant dense<0.000000e+00> : vector<8x128xf32>
    %9 = tpu.matmul %7, %8, %cst_8 {dimension_numbers = #tpu.dot_dimension_numbers<[1], [0], [0], [1], [0, 0, 1, 1], [], []>} : vector<8x128xf32>, vector<128x128xf32>, vector<8x128xf32> -> vector<8x128xf32>
    %c0_9 = arith.constant 0 : index
    %c0_10 = arith.constant 0 : index
    %10 = vector.load %arg5[%c0_9, %c0_10] : memref<1x128xf32, #tpu.memory_space<vmem>>, vector<1x128xf32>
    %11 = vector.broadcast %10 : vector<1x128xf32> to vector<8x128xf32>
    %12 = arith.addf %9, %11 : vector<8x128xf32>
    %cst_11 = arith.constant 0.000000e+00 : f32
    %13 = vector.broadcast %cst_11 : f32 to vector<8x128xf32>
    %14 = arith.maximumf %12, %13 : vector<8x128xf32>
    %c0_12 = arith.constant 0 : index
    %c0_13 = arith.constant 0 : index
    %15 = vector.load %arg6[%c0_12, %c0_13] : memref<128x128xf32, #tpu.memory_space<vmem>>, vector<128x128xf32>
    %cst_14 = arith.constant dense<0.000000e+00> : vector<8x128xf32>
    %16 = tpu.matmul %14, %15, %cst_14 {dimension_numbers = #tpu.dot_dimension_numbers<[1], [0], [0], [1], [0, 0, 1, 1], [], []>} : vector<8x128xf32>, vector<128x128xf32>, vector<8x128xf32> -> vector<8x128xf32>
    %c0_15 = arith.constant 0 : index
    %c0_16 = arith.constant 0 : index
    %17 = vector.load %arg7[%c0_15, %c0_16] : memref<1x128xf32, #tpu.memory_space<vmem>>, vector<1x128xf32>
    %18 = vector.broadcast %17 : vector<1x128xf32> to vector<8x128xf32>
    %19 = arith.addf %16, %18 : vector<8x128xf32>
    %cst_17 = arith.constant 0.000000e+00 : f32
    %20 = vector.broadcast %cst_17 : f32 to vector<8x128xf32>
    %21 = arith.maximumf %19, %20 : vector<8x128xf32>
    %c0_18 = arith.constant 0 : index
    %c0_19 = arith.constant 0 : index
    %22 = vector.load %arg8[%c0_18, %c0_19] : memref<8x128xf32, #tpu.memory_space<vmem>>, vector<8x128xf32>
    tpu.vector_store %arg8[%c0_18, %c0_19], %21 {strides = array<i32>} : memref<8x128xf32, #tpu.memory_space<vmem>>, vector<8x128xf32>,
    return
  }
  func.func @transform_0(%arg0: i32) -> (i32, i32) {
    %c0_i32 = arith.constant 0 : i32
    %c0_i32_0 = arith.constant 0 : i32
    return %arg0, %c0_i32 : i32, i32
  }
  func.func @transform_1(%arg0: i32) -> (i32, i32) {
    %c0_i32 = arith.constant 0 : i32
    %c0_i32_0 = arith.constant 0 : i32
    %c0_i32_1 = arith.constant 0 : i32
    return %c0_i32, %c0_i32_0 : i32, i32
  }
  func.func @transform_2(%arg0: i32) -> (i32, i32) {
    %c0_i32 = arith.constant 0 : i32
    %c0_i32_0 = arith.constant 0 : i32
    %c0_i32_1 = arith.constant 0 : i32
    return %c0_i32, %c0_i32_0 : i32, i32
  }
  func.func @transform_3(%arg0: i32) -> (i32, i32) {
    %c0_i32 = arith.constant 0 : i32
    %c0_i32_0 = arith.constant 0 : i32
    %c0_i32_1 = arith.constant 0 : i32
    return %c0_i32, %c0_i32_0 : i32, i32
  }
  func.func @transform_4(%arg0: i32) -> (i32, i32) {
    %c0_i32 = arith.constant 0 : i32
    %c0_i32_0 = arith.constant 0 : i32
    %c0_i32_1 = arith.constant 0 : i32
    return %c0_i32, %c0_i32_0 : i32, i32
  }
  func.func @transform_5(%arg0: i32) -> (i32, i32) {
    %c0_i32 = arith.constant 0 : i32
    %c0_i32_0 = arith.constant 0 : i32
    %c0_i32_1 = arith.constant 0 : i32
    return %c0_i32, %c0_i32_0 : i32, i32
  }
  func.func @transform_6(%arg0: i32) -> (i32, i32) {
    %c0_i32 = arith.constant 0 : i32
    %c0_i32_0 = arith.constant 0 : i32
    %c0_i32_1 = arith.constant 0 : i32
    return %c0_i32, %c0_i32_0 : i32, i32
  }
  func.func @transform_7(%arg0: i32) -> (i32, i32) {
    %c0_i32 = arith.constant 0 : i32
    %c0_i32_0 = arith.constant 0 : i32
    return %arg0, %c0_i32 : i32, i32
  }
}

module attributes {stable_mosaic.version = 11 : i64} {
  func.func @_mlp_kernel(%arg0: i32, %arg1: memref<8x128xf32, #tpu.memory_space<vmem>>, %arg2: memref<128x128xf32, #tpu.memory_space<vmem>>, %arg3: memref<1x128xf32, #tpu.memory_space<vmem>>, %arg4: memref<128x128xf32, #tpu.memory_space<vmem>>, %arg5: memref<1x128xf32, #tpu.memory_space<vmem>>, %arg6: memref<128x128xf32, #tpu.memory_space<vmem>>, %arg7: memref<1x128xf32, #tpu.memory_space<vmem>>, %arg8: memref<8x128xf32, #tpu.memory_space<vmem>>) attributes {dimension_semantics = [#tpu.dimension_semantics<parallel>], iteration_bounds = array<i64: 1>, scalar_prefetch = 0 : i64, scratch_operands = 0 : i64, tpu.core_type = #tpu.core_type<tc>, window_params = [{transform_indices = @transform_0, window_bounds = array<i64: 8, 128>}, {pipeline_mode = #tpu.pipeline_mode<synchronous>, transform_indices = @transform_1, window_bounds = array<i64: 128, 128>}, {pipeline_mode = #tpu.pipeline_mode<synchronous>, transform_indices = @transform_2, window_bounds = array<i64: 1, 128>}, {pipeline_mode = #tpu.pipeline_mode<synchronous>, transform_indices = @transform_3, window_bounds = array<i64: 128, 128>}, {pipeline_mode = #tpu.pipeline_mode<synchronous>, transform_indices = @transform_4, window_bounds = array<i64: 1, 128>}, {pipeline_mode = #tpu.pipeline_mode<synchronous>, transform_indices = @transform_5, window_bounds = array<i64: 128, 128>}, {pipeline_mode = #tpu.pipeline_mode<synchronous>, transform_indices = @transform_6, window_bounds = array<i64: 1, 128>}, {transform_indices = @transform_7, window_bounds = array<i64: 8, 128>}]} {
    %c0 = arith.constant 0 : index
    %c0_0 = arith.constant 0 : index
    %0 = vector.load %arg1[%c0, %c0_0] : memref<8x128xf32, #tpu.memory_space<vmem>>, vector<8x128xf32>
    %c0_1 = arith.constant 0 : index
    %c0_2 = arith.constant 0 : index
    %1 = vector.load %arg2[%c0_1, %c0_2] : memref<128x128xf32, #tpu.memory_space<vmem>>, vector<128x128xf32>
    %cst = arith.constant dense<0.000000e+00> : vector<8x128xf32>
    %2 = tpu.matmul %0, %1, %cst {dimension_numbers = #tpu.dot_dimension_numbers<[1], [0], [0], [1], [0, 0, 1, 1], [], []>} : vector<8x128xf32>, vector<128x128xf32>, vector<8x128xf32> -> vector<8x128xf32>
    %c0_3 = arith.constant 0 : index
    %c0_4 = arith.constant 0 : index
    %3 = vector.load %arg3[%c0_3, %c0_4] : memref<1x128xf32, #tpu.memory_space<vmem>>, vector<1x128xf32>
    %4 = vector.broadcast %3 : vector<1x128xf32> to vector<8x128xf32>
    %5 = arith.addf %2, %4 : vector<8x128xf32>
    %cst_5 = arith.constant 0.000000e+00 : f32
    %6 = vector.broadcast %cst_5 : f32 to vector<8x128xf32>
    %7 = arith.maximumf %5, %6 : vector<8x128xf32>
    %c0_6 = arith.constant 0 : index
    %c0_7 = arith.constant 0 : index
    %8 = vector.load %arg4[%c0_6, %c0_7] : memref<128x128xf32, #tpu.memory_space<vmem>>, vector<128x128xf32>
    %cst_8 = arith.constant dense<0.000000e+00> : vector<8x128xf32>
    %9 = tpu.matmul %7, %8, %cst_8 {dimension_numbers = #tpu.dot_dimension_numbers<[1], [0], [0], [1], [0, 0, 1, 1], [], []>} : vector<8x128xf32>, vector<128x128xf32>, vector<8x128xf32> -> vector<8x128xf32>
    %c0_9 = arith.constant 0 : index
    %c0_10 = arith.constant 0 : index
    %10 = vector.load %arg5[%c0_9, %c0_10] : memref<1x128xf32, #tpu.memory_space<vmem>>, vector<1x128xf32>
    %11 = vector.broadcast %10 : vector<1x128xf32> to vector<8x128xf32>
    %12 = arith.addf %9, %11 : vector<8x128xf32>
    %cst_11 = arith.constant 0.000000e+00 : f32
    %13 = vector.broadcast %cst_11 : f32 to vector<8x128xf32>
    %14 = arith.maximumf %12, %13 : vector<8x128xf32>
    %c0_12 = arith.constant 0 : index
    %c0_13 = arith.constant 0 : index
    %15 = vector.load %arg6[%c0_12, %c0_13] : memref<128x128xf32, #tpu.memory_space<vmem>>, vector<128x128xf32>
    %cst_14 = arith.constant dense<0.000000e+00> : vector<8x128xf32>
    %16 = tpu.matmul %14, %15, %cst_14 {dimension_numbers = #tpu.dot_dimension_numbers<[1], [0], [0], [1], [0, 0, 1, 1], [], []>} : vector<8x128xf32>, vector<128x128xf32>, vector<8x128xf32> -> vector<8x128xf32>
    %c0_15 = arith.constant 0 : index
    %c0_16 = arith.constant 0 : index
    %17 = vector.load %arg7[%c0_15, %c0_16] : memref<1x128xf32, #tpu.memory_space<vmem>>, vector<1x128xf32>
    %18 = vector.broadcast %17 : vector<1x128xf32> to vector<8x128xf32>
    %19 = arith.addf %16, %18 : vector<8x128xf32>
    %cst_17 = arith.constant 0.000000e+00 : f32
    %20 = vector.broadcast %cst_17 : f32 to vector<8x128xf32>
    %21 = arith.maximumf %19, %20 : vector<8x128xf32>
    %c0_18 = arith.constant 0 : index
    %c0_19 = arith.constant 0 : index
    %22 = vector.load %arg8[%c0_18, %c0_19] : memref<8x128xf32, #tpu.memory_space<vmem>>, vector<8x128xf32>
    tpu.vector_store %arg8[%c0_18, %c0_19], %21 {strides = array<i32>} : memref<8x128xf32, #tpu.memory_space<vmem>>, vector<8x128xf32>,
    return
  }
  func.func @transform_0(%arg0: i32) -> (i32, i32) {
    %c0_i32 = arith.constant 0 : i32
    %c0_i32_0 = arith.constant 0 : i32
    return %arg0, %c0_i32 : i32, i32
  }
  func.func @transform_1(%arg0: i32) -> (i32, i32) {
    %c0_i32 = arith.constant 0 : i32
    %c0_i32_0 = arith.constant 0 : i32
    %c0_i32_1 = arith.constant 0 : i32
    return %c0_i32, %c0_i32_0 : i32, i32
  }
  func.func @transform_2(%arg0: i32) -> (i32, i32) {
    %c0_i32 = arith.constant 0 : i32
    %c0_i32_0 = arith.constant 0 : i32
    %c0_i32_1 = arith.constant 0 : i32
    return %c0_i32, %c0_i32_0 : i32, i32
  }
  func.func @transform_3(%arg0: i32) -> (i32, i32) {
    %c0_i32 = arith.constant 0 : i32
    %c0_i32_0 = arith.constant 0 : i32
    %c0_i32_1 = arith.constant 0 : i32
    return %c0_i32, %c0_i32_0 : i32, i32
  }
  func.func @transform_4(%arg0: i32) -> (i32, i32) {
    %c0_i32 = arith.constant 0 : i32
    %c0_i32_0 = arith.constant 0 : i32
    %c0_i32_1 = arith.constant 0 : i32
    return %c0_i32, %c0_i32_0 : i32, i32
  }
  func.func @transform_5(%arg0: i32) -> (i32, i32) {
    %c0_i32 = arith.constant 0 : i32
    %c0_i32_0 = arith.constant 0 : i32
    %c0_i32_1 = arith.constant 0 : i32
    return %c0_i32, %c0_i32_0 : i32, i32
  }
  func.func @transform_6(%arg0: i32) -> (i32, i32) {
    %c0_i32 = arith.constant 0 : i32
    %c0_i32_0 = arith.constant 0 : i32
    %c0_i32_1 = arith.constant 0 : i32
    return %c0_i32, %c0_i32_0 : i32, i32
  }
  func.func @transform_7(%arg0: i32) -> (i32, i32) {
    %c0_i32 = arith.constant 0 : i32
    %c0_i32_0 = arith.constant 0 : i32
    return %arg0, %c0_i32 : i32, i32
  }
}

</mosaic_0001>

<bundles_post_ra>
// kernel: tpu_custom_call.1
= control target key start
LH: loop header
LB: loop body
LE: loop exit
PB: predicated region body
PF: predicated region fallthrough
CT: control target
= control target key end

     0   :  { %12 = vsyncpa [#allocation3], 0  ;;  %s441_s0 = inlined_call_operand.hbm [shape: f32[8,128], index: 0, kind: input, shape index: {}]   ;;  %s442_s1 = inlined_call_operand.hbm [shape: f32[128,128], index: 1, kind: input, shape index: {}]   ;;  %s443_s2 = inlined_call_operand.vmem [shape: f32[1,128], index: 2, kind: input, shape index: {}]   ;;  %s444_s3 = inlined_call_operand.hbm [shape: f32[128,128], index: 3, kind: input, shape index: {}]   ;;  %s445_s4 = inlined_call_operand.vmem [shape: f32[1,128], index: 4, kind: input, shape index: {}]   ;;  %s446_s5 = inlined_call_operand.hbm [shape: f32[128,128], index: 5, kind: input, shape index: {}]   ;;  %s447_s6 = inlined_call_operand.vmem [shape: f32[1,128], index: 6, kind: input, shape index: {}]   ;;  %s448_s7 = inlined_call_operand.hbm [shape: f32[8,128], index: 7, kind: output, shape index: {}]  }
   0x1   :  { %13 = vsyncpa [#allocation6], 0 }
   0x2   :  { %14 = vsyncpa [#allocation9], 0  ;;  %s31_s26 = sshll.u32 %s442_s1, 4  ;;  %s32_s26 = int_to_ptr.hbm [resolvable:$true] %s31_s26 }
   0x3   :  { %15 = vsyncpa [#allocation4], 0  ;;  %s370_s27 = smov [#allocation5]   ;;  %s21_s8 = sshll.u32 %s441_s0, 4  ;;  %s22_s8 = int_to_ptr.hbm [resolvable:$true] %s21_s8 }
   0x4   :  { %s33_s28 = sshll.u32 %s370_s27, 4  ;;  %s371_s9 = smov 128   ;;  %s34_s28 = int_to_ptr.vmem [resolvable:$true] %s33_s28 }
   0x5   :  { %s372_s10 = smov 8   ;;  %s373_s11 = smov [#allocation2]  }
   0x6   :  { %39 = dma.hbm_to_vmem [thread:$0]  %s32_s26, 2048, %s34_s28, [#allocation6], %s371_s9, %s371_s9, %s372_s10  }
   0x7   :  { %s23_s12 = sshll.u32 %s373_s11, 4  ;;  %s46_s15 = sshll.u32 %s444_s3, 4  ;;  %s24_s12 = int_to_ptr.vmem [resolvable:$true] %s23_s12  ;;  %s47_s15 = int_to_ptr.hbm [resolvable:$true] %s46_s15 }
   0x8   :  { %26 = dma.hbm_to_vmem [thread:$0]  %s22_s8, 128, %s24_s12, [#allocation3]  }
   0x9   :  { %s61_s17 = sshll.u32 %s446_s5, 4  ;;  %s374_s18 = smov [#allocation7]   ;;  %s62_s17 = int_to_ptr.hbm [resolvable:$true] %s61_s17 }
   0xa   :  { %s48_s19 = sshll.u32 %s374_s18, 4  ;;  %s375_s0 = smov [#allocation8]   ;;  %s49_s19 = int_to_ptr.vmem [resolvable:$true] %s48_s19 }
   0xb   :  { %54 = dma.hbm_to_vmem [thread:$0]  %s47_s15, 2048, %s49_s19, [#allocation6], %s371_s9, %s371_s9, %s372_s10  }
   0xc   :  { %s63_s20 = sshll.u32 %s375_s0, 4  ;;  %s64_s20 = int_to_ptr.vmem [resolvable:$true] %s63_s20 }
   0xd   :  { %69 = dma.hbm_to_vmem [thread:$0]  %s62_s17, 2048, %s64_s20, [#allocation9], %s371_s9, %s371_s9, %s372_s10  }
   0xe   :  { %362 = dma.done.wait [#allocation3], 128  }
   0xf   :  { %363 = vsyncadd [#allocation3], 4294967168 }
  0x10   :  { %364 = dma.done.wait [#allocation6], 4096  }
  0x11   :  { %365 = vsyncadd [#allocation6], 4294963200 }
  0x12   :  { %366 = dma.done.wait [#allocation9], 2048  }
  0x13   :  { %367 = vsyncadd [#allocation9], 4294965248  ;;  %v104_v0 = vld [vmem:[#allocation5 + $0x78] sm:$0xff]  ;;  %v103_v1 = vld [vmem:[#allocation5 + $0x70] sm:$0xff]  ;;  %s376_s24 = smov [#allocation10]   ;;  %s220_s28 = sshll.u32 %s448_s7, 4  ;;  %s221_s28 = int_to_ptr.hbm [resolvable:$true] %s220_s28 }
  0x14   :  { %109 = vmatpush.msra.mxu0 %v104_v0  ;;  %v102_v2 = vld [vmem:[#allocation5 + $0x68] sm:$0xff]  ;;  %v101_v3 = vld [vmem:[#allocation5 + $0x60] sm:$0xff]  ;;  %v145_v4 = vld [vmem:[#allocation7 + $0x78] sm:$0xff]  ;;  %s218_s25 = sshll.u32 %s376_s24, 4  ;;  %s219_s25 = int_to_ptr.vmem [resolvable:$true] %s218_s25 }
  0x15   :  { %v100_v5 = vld [vmem:[#allocation5 + $0x58] sm:$0xff]  ;;  %150 = vmatpush.msra.mxu1 %v145_v4  ;;  %v144_v6 = vld [vmem:[#allocation7 + $0x70] sm:$0xff]  ;;  %v143_v7 = vld [vmem:[#allocation7 + $0x68] sm:$0xff] }
  0x16   :  { %110 = vmatpush.msra.mxu0 %v103_v1  ;;  %v99_v8 = vld [vmem:[#allocation5 + $0x50] sm:$0xff]  ;;  %v142_v9 = vld [vmem:[#allocation7 + $0x60] sm:$0xff]  ;;  %v98_v10 = vld [vmem:[#allocation5 + $0x48] sm:$0xff] }
  0x17   :  { %151 = vmatpush.msra.mxu1 %v144_v6  ;;  %v141_v11 = vld [vmem:[#allocation7 + $0x58] sm:$0xff]  ;;  %v97_v12 = vld [vmem:[#allocation5 + $0x40] sm:$0xff]  ;;  %v140_v13 = vld [vmem:[#allocation7 + $0x50] sm:$0xff] }
  0x18   :  { %111 = vmatpush.msra.mxu0 %v102_v2  ;;  %v96_v14 = vld [vmem:[#allocation5 + $0x38] sm:$0xff]  ;;  %v139_v15 = vld [vmem:[#allocation7 + $0x48] sm:$0xff]  ;;  %v95_v16 = vld [vmem:[#allocation5 + $0x30] sm:$0xff] }
  0x19   :  { %152 = vmatpush.msra.mxu1 %v143_v7  ;;  %v138_v17 = vld [vmem:[#allocation7 + $0x40] sm:$0xff]  ;;  %v94_v18 = vld [vmem:[#allocation5 + $0x28] sm:$0xff]  ;;  %v137_v19 = vld [vmem:[#allocation7 + $0x38] sm:$0xff] }
  0x1a   :  { %112 = vmatpush.msra.mxu0 %v101_v3  ;;  %v93_v20 = vld [vmem:[#allocation5 + $0x20] sm:$0xff]  ;;  %v136_v21 = vld [vmem:[#allocation7 + $0x30] sm:$0xff]  ;;  %v92_v22 = vld [vmem:[#allocation5 + $0x18] sm:$0xff] }
  0x1b   :  { %153 = vmatpush.msra.mxu1 %v142_v9  ;;  %v135_v23 = vld [vmem:[#allocation7 + $0x28] sm:$0xff]  ;;  %v91_v24 = vld [vmem:[#allocation5 + $0x10] sm:$0xff]  ;;  %v134_v25 = vld [vmem:[#allocation7 + $0x20] sm:$0xff] }
  0x1c   :  { %113 = vmatpush.msra.mxu0 %v100_v5  ;;  %v90_v26 = vld [vmem:[#allocation5 + $0x8] sm:$0xff]  ;;  %v133_v27 = vld [vmem:[#allocation7 + $0x18] sm:$0xff]  ;;  %v89_v28 = vld [vmem:[#allocation5] sm:$0xff] }
  0x1d   :  { %154 = vmatpush.msra.mxu1 %v141_v11  ;;  %v88_v29 = vld [vmem:[#allocation2] sm:$0xff]  ;;  %v132_v30 = vld [vmem:[#allocation7 + $0x10] sm:$0xff]  ;;  %v131_v31 = vld [vmem:[#allocation7 + $0x8] sm:$0xff] }
  0x1e   :  { %114 = vmatpush.msra.mxu0 %v99_v8  ;;  %v130_v32 = vld [vmem:[#allocation7] sm:$0xff]  ;;  %v186_v33 = vld [vmem:[#allocation8 + $0x78] sm:$0xff]  ;;  %v185_v34 = vld [vmem:[#allocation8 + $0x70] sm:$0xff] }
  0x1f   :  { %155 = vmatpush.msra.mxu1 %v140_v13  ;;  %191 = vmatpush.msra.mxu2 %v186_v33  ;;  %v184_v35 = vld [vmem:[#allocation8 + $0x68] sm:$0xff]  ;;  %v183_v36 = vld [vmem:[#allocation8 + $0x60] sm:$0xff]  ;;  %v182_v37 = vld [vmem:[#allocation8 + $0x58] sm:$0xff] }
  0x20   :  { %115 = vmatpush.msra.mxu0 %v98_v10  ;;  %v181_v38 = vld [vmem:[#allocation8 + $0x50] sm:$0xff]  ;;  %v180_v39 = vld [vmem:[#allocation8 + $0x48] sm:$0xff]  ;;  %v179_v40 = vld [vmem:[#allocation8 + $0x40] sm:$0xff] }
  0x21   :  { %156 = vmatpush.msra.mxu1 %v139_v15  ;;  %192 = vmatpush.msra.mxu2 %v185_v34  ;;  %v178_v41 = vld [vmem:[#allocation8 + $0x38] sm:$0xff]  ;;  %v177_v42 = vld [vmem:[#allocation8 + $0x30] sm:$0xff]  ;;  %v176_v43 = vld [vmem:[#allocation8 + $0x28] sm:$0xff] }
  0x22   :  { %116 = vmatpush.msra.mxu0 %v97_v12  ;;  %v175_v44 = vld [vmem:[#allocation8 + $0x20] sm:$0xff]  ;;  %v174_v45 = vld [vmem:[#allocation8 + $0x18] sm:$0xff]  ;;  %v173_v50 = vld [vmem:[#allocation8 + $0x10] sm:$0xff] }
  0x23   :  { %157 = vmatpush.msra.mxu1 %v138_v17  ;;  %193 = vmatpush.msra.mxu2 %v184_v35  ;;  %v239_v46 = vld [vmem:[%s443_s2] ss:$0 sm:$0xff]  ;;  %v172_v51 = vld [vmem:[#allocation8 + $0x8] sm:$0xff]  ;;  %v171_v52 = vld [vmem:[#allocation8] sm:$0xff] }
  0x24   :  { %117 = vmatpush.msra.mxu0 %v96_v14  ;;  %v240_v53 = vld [vmem:[%s445_s4] ss:$0 sm:$0xff] }
  0x25   :  { %158 = vmatpush.msra.mxu1 %v137_v19  ;;  %194 = vmatpush.msra.mxu2 %v183_v36  ;;  %v241_v57 = vld [vmem:[%s447_s6] ss:$0 sm:$0xff] }
  0x26   :  { %118 = vmatpush.msra.mxu0 %v95_v16 }
  0x27   :  { %159 = vmatpush.msra.mxu1 %v136_v21  ;;  %195 = vmatpush.msra.mxu2 %v182_v37 }
  0x28   :  { %119 = vmatpush.msra.mxu0 %v94_v18 }
  0x29   :  { %160 = vmatpush.msra.mxu1 %v135_v23  ;;  %196 = vmatpush.msra.mxu2 %v181_v38 }
  0x2a   :  { %120 = vmatpush.msra.mxu0 %v93_v20 }
  0x2b   :  { %161 = vmatpush.msra.mxu1 %v134_v25  ;;  %197 = vmatpush.msra.mxu2 %v180_v39 }
  0x2c   :  { %121 = vmatpush.msra.mxu0 %v92_v22 }
  0x2d   :  { %162 = vmatpush.msra.mxu1 %v133_v27  ;;  %198 = vmatpush.msra.mxu2 %v179_v40 }
  0x2e   :  { %122 = vmatpush.msra.mxu0 %v91_v24 }
  0x2f   :  { %163 = vmatpush.msra.mxu1 %v132_v30  ;;  %199 = vmatpush.msra.mxu2 %v178_v41 }
  0x30   :  { %123 = vmatpush.msra.mxu0 %v90_v26 }
  0x31   :  { %164 = vmatpush.msra.mxu1 %v131_v31  ;;  %200 = vmatpush.msra.mxu2 %v177_v42 }
  0x32   :  { %124 = vmatpush.msra.mxu0 %v89_v28 }
  0x33   :  { %125 = vmatmul.f32.vlgmr.msra.gmra.mxu0 %v88_v29  ;;  %165 = vmatpush.msra.mxu1 %v130_v32 }
  0x34   :  { %201 = vmatpush.msra.mxu2 %v176_v43 }
  0x36   :  { %202 = vmatpush.msra.mxu2 %v175_v44 }
  0x38   :  { %203 = vmatpush.msra.mxu2 %v174_v45 }
  0x3a   :  { %204 = vmatpush.msra.mxu2 %v173_v50 }
  0x3c   :  { %205 = vmatpush.msra.mxu2 %v172_v51 }
  0x3e   :  { %206 = vmatpush.msra.mxu2 %v171_v52 }
  0xb0   :  { %v126_v47 = vpop.f32.mrf.mxu0 }
  0xb1   :  { %v127_v48 = vadd.f32 %v239_v46, %v126_v47 }
  0xb3   :  { %v129_v49 = vmax.f32 %v127_v48, 0.0 }
  0xb5   :  { %166 = vmatmul.f32.vlgmr.msra.gmra.mxu1 %v129_v49 }
 0x132   :  { %v167_v54 = vpop.f32.mrf.mxu1 }
 0x133   :  { %v168_v55 = vadd.f32 %v240_v53, %v167_v54 }
 0x135   :  { %v170_v56 = vmax.f32 %v168_v55, 0.0 }
 0x137   :  { %207 = vmatmul.f32.vlgmr.msra.gmra.mxu2 %v170_v56 }
 0x1ba   :  { %v208_v58 = vpop.f32.mrf.mxu2 }
 0x1bb   :  { %v209_v59 = vadd.f32 %v241_v57, %v208_v58 }
 0x1bd   :  { %v211_v60 = vmax.f32 %v209_v59, 0.0 }
 0x1bf   :  { %212 = vst [vmem:[#allocation10] sm:$0xff] %v211_v60 }
 0x1c0   :  { %223 = dma.vmem_to_hbm [thread:$0]  %s219_s25, 128, %s221_s28, [#allocation4]  }
 0x1c1   :  { %368 = dma.done.wait [#allocation4], 128  }
 0x1c2   :  { %369 = vsyncadd [#allocation4], 4294967168 }
 0x1c3   :  { %228 = vsyncpa [#allocation3], 1 }
 0x1c4   :  { %229 = vsyncpa [#allocation6], 1 }
 0x1c5   :  { %230 = vsyncpa [#allocation9], 1 }
 0x1c6   :  { %231 = vsyncpa [#allocation4], 1 }

// kernel: tpu_custom_call.1
= control target key start
LH: loop header
LB: loop body
LE: loop exit
PB: predicated region body
PF: predicated region fallthrough
CT: control target
= control target key end

     0   :  { %12 = vsyncpa [#allocation3], 0  ;;  %s441_s0 = inlined_call_operand.hbm [shape: f32[8,128], index: 0, kind: input, shape index: {}]   ;;  %s442_s1 = inlined_call_operand.hbm [shape: f32[128,128], index: 1, kind: input, shape index: {}]   ;;  %s443_s2 = inlined_call_operand.vmem [shape: f32[1,128], index: 2, kind: input, shape index: {}]   ;;  %s444_s3 = inlined_call_operand.hbm [shape: f32[128,128], index: 3, kind: input, shape index: {}]   ;;  %s445_s4 = inlined_call_operand.vmem [shape: f32[1,128], index: 4, kind: input, shape index: {}]   ;;  %s446_s5 = inlined_call_operand.hbm [shape: f32[128,128], index: 5, kind: input, shape index: {}]   ;;  %s447_s6 = inlined_call_operand.vmem [shape: f32[1,128], index: 6, kind: input, shape index: {}]   ;;  %s448_s7 = inlined_call_operand.hbm [shape: f32[8,128], index: 7, kind: output, shape index: {}]  }
   0x1   :  { %13 = vsyncpa [#allocation6], 0 }
   0x2   :  { %14 = vsyncpa [#allocation9], 0  ;;  %s31_s26 = sshll.u32 %s442_s1, 4  ;;  %s32_s26 = int_to_ptr.hbm [resolvable:$true] %s31_s26 }
   0x3   :  { %15 = vsyncpa [#allocation4], 0  ;;  %s370_s27 = smov [#allocation5]   ;;  %s21_s8 = sshll.u32 %s441_s0, 4  ;;  %s22_s8 = int_to_ptr.hbm [resolvable:$true] %s21_s8 }
   0x4   :  { %s33_s28 = sshll.u32 %s370_s27, 4  ;;  %s371_s9 = smov 128   ;;  %s34_s28 = int_to_ptr.vmem [resolvable:$true] %s33_s28 }
   0x5   :  { %s372_s10 = smov 8   ;;  %s373_s11 = smov [#allocation2]  }
   0x6   :  { %39 = dma.hbm_to_vmem [thread:$0]  %s32_s26, 2048, %s34_s28, [#allocation6], %s371_s9, %s371_s9, %s372_s10  }
   0x7   :  { %s23_s12 = sshll.u32 %s373_s11, 4  ;;  %s46_s15 = sshll.u32 %s444_s3, 4  ;;  %s24_s12 = int_to_ptr.vmem [resolvable:$true] %s23_s12  ;;  %s47_s15 = int_to_ptr.hbm [resolvable:$true] %s46_s15 }
   0x8   :  { %26 = dma.hbm_to_vmem [thread:$0]  %s22_s8, 128, %s24_s12, [#allocation3]  }
   0x9   :  { %s61_s17 = sshll.u32 %s446_s5, 4  ;;  %s374_s18 = smov [#allocation7]   ;;  %s62_s17 = int_to_ptr.hbm [resolvable:$true] %s61_s17 }
   0xa   :  { %s48_s19 = sshll.u32 %s374_s18, 4  ;;  %s375_s0 = smov [#allocation8]   ;;  %s49_s19 = int_to_ptr.vmem [resolvable:$true] %s48_s19 }
   0xb   :  { %54 = dma.hbm_to_vmem [thread:$0]  %s47_s15, 2048, %s49_s19, [#allocation6], %s371_s9, %s371_s9, %s372_s10  }
   0xc   :  { %s63_s20 = sshll.u32 %s375_s0, 4  ;;  %s64_s20 = int_to_ptr.vmem [resolvable:$true] %s63_s20 }
   0xd   :  { %69 = dma.hbm_to_vmem [thread:$0]  %s62_s17, 2048, %s64_s20, [#allocation9], %s371_s9, %s371_s9, %s372_s10  }
   0xe   :  { %362 = dma.done.wait [#allocation3], 128  }
   0xf   :  { %363 = vsyncadd [#allocation3], 4294967168 }
  0x10   :  { %364 = dma.done.wait [#allocation6], 4096  }
  0x11   :  { %365 = vsyncadd [#allocation6], 4294963200 }
  0x12   :  { %366 = dma.done.wait [#allocation9], 2048  }
  0x13   :  { %367 = vsyncadd [#allocation9], 4294965248  ;;  %v104_v0 = vld [vmem:[#allocation5 + $0x78] sm:$0xff]  ;;  %v103_v1 = vld [vmem:[#allocation5 + $0x70] sm:$0xff]  ;;  %s376_s24 = smov [#allocation10]   ;;  %s220_s28 = sshll.u32 %s448_s7, 4  ;;  %s221_s28 = int_to_ptr.hbm [resolvable:$true] %s220_s28 }
  0x14   :  { %109 = vmatpush.msra.mxu0 %v104_v0  ;;  %v102_v2 = vld [vmem:[#allocation5 + $0x68] sm:$0xff]  ;;  %v101_v3 = vld [vmem:[#allocation5 + $0x60] sm:$0xff]  ;;  %v145_v4 = vld [vmem:[#allocation7 + $0x78] sm:$0xff]  ;;  %s218_s25 = sshll.u32 %s376_s24, 4  ;;  %s219_s25 = int_to_ptr.vmem [resolvable:$true] %s218_s25 }
  0x15   :  { %v100_v5 = vld [vmem:[#allocation5 + $0x58] sm:$0xff]  ;;  %150 = vmatpush.msra.mxu1 %v145_v4  ;;  %v144_v6 = vld [vmem:[#allocation7 + $0x70] sm:$0xff]  ;;  %v143_v7 = vld [vmem:[#allocation7 + $0x68] sm:$0xff] }
  0x16   :  { %110 = vmatpush.msra.mxu0 %v103_v1  ;;  %v99_v8 = vld [vmem:[#allocation5 + $0x50] sm:$0xff]  ;;  %v142_v9 = vld [vmem:[#allocation7 + $0x60] sm:$0xff]  ;;  %v98_v10 = vld [vmem:[#allocation5 + $0x48] sm:$0xff] }
  0x17   :  { %151 = vmatpush.msra.mxu1 %v144_v6  ;;  %v141_v11 = vld [vmem:[#allocation7 + $0x58] sm:$0xff]  ;;  %v97_v12 = vld [vmem:[#allocation5 + $0x40] sm:$0xff]  ;;  %v140_v13 = vld [vmem:[#allocation7 + $0x50] sm:$0xff] }
  0x18   :  { %111 = vmatpush.msra.mxu0 %v102_v2  ;;  %v96_v14 = vld [vmem:[#allocation5 + $0x38] sm:$0xff]  ;;  %v139_v15 = vld [vmem:[#allocation7 + $0x48] sm:$0xff]  ;;  %v95_v16 = vld [vmem:[#allocation5 + $0x30] sm:$0xff] }
  0x19   :  { %152 = vmatpush.msra.mxu1 %v143_v7  ;;  %v138_v17 = vld [vmem:[#allocation7 + $0x40] sm:$0xff]  ;;  %v94_v18 = vld [vmem:[#allocation5 + $0x28] sm:$0xff]  ;;  %v137_v19 = vld [vmem:[#allocation7 + $0x38] sm:$0xff] }
  0x1a   :  { %112 = vmatpush.msra.mxu0 %v101_v3  ;;  %v93_v20 = vld [vmem:[#allocation5 + $0x20] sm:$0xff]  ;;  %v136_v21 = vld [vmem:[#allocation7 + $0x30] sm:$0xff]  ;;  %v92_v22 = vld [vmem:[#allocation5 + $0x18] sm:$0xff] }
  0x1b   :  { %153 = vmatpush.msra.mxu1 %v142_v9  ;;  %v135_v23 = vld [vmem:[#allocation7 + $0x28] sm:$0xff]  ;;  %v91_v24 = vld [vmem:[#allocation5 + $0x10] sm:$0xff]  ;;  %v134_v25 = vld [vmem:[#allocation7 + $0x20] sm:$0xff] }
  0x1c   :  { %113 = vmatpush.msra.mxu0 %v100_v5  ;;  %v90_v26 = vld [vmem:[#allocation5 + $0x8] sm:$0xff]  ;;  %v133_v27 = vld [vmem:[#allocation7 + $0x18] sm:$0xff]  ;;  %v89_v28 = vld [vmem:[#allocation5] sm:$0xff] }
  0x1d   :  { %154 = vmatpush.msra.mxu1 %v141_v11  ;;  %v88_v29 = vld [vmem:[#allocation2] sm:$0xff]  ;;  %v132_v30 = vld [vmem:[#allocation7 + $0x10] sm:$0xff]  ;;  %v131_v31 = vld [vmem:[#allocation7 + $0x8] sm:$0xff] }
  0x1e   :  { %114 = vmatpush.msra.mxu0 %v99_v8  ;;  %v130_v32 = vld [vmem:[#allocation7] sm:$0xff]  ;;  %v186_v33 = vld [vmem:[#allocation8 + $0x78] sm:$0xff]  ;;  %v185_v34 = vld [vmem:[#allocation8 + $0x70] sm:$0xff] }
  0x1f   :  { %155 = vmatpush.msra.mxu1 %v140_v13  ;;  %191 = vmatpush.msra.mxu2 %v186_v33  ;;  %v184_v35 = vld [vmem:[#allocation8 + $0x68] sm:$0xff]  ;;  %v183_v36 = vld [vmem:[#allocation8 + $0x60] sm:$0xff]  ;;  %v182_v37 = vld [vmem:[#allocation8 + $0x58] sm:$0xff] }
  0x20   :  { %115 = vmatpush.msra.mxu0 %v98_v10  ;;  %v181_v38 = vld [vmem:[#allocation8 + $0x50] sm:$0xff]  ;;  %v180_v39 = vld [vmem:[#allocation8 + $0x48] sm:$0xff]  ;;  %v179_v40 = vld [vmem:[#allocation8 + $0x40] sm:$0xff] }
  0x21   :  { %156 = vmatpush.msra.mxu1 %v139_v15  ;;  %192 = vmatpush.msra.mxu2 %v185_v34  ;;  %v178_v41 = vld [vmem:[#allocation8 + $0x38] sm:$0xff]  ;;  %v177_v42 = vld [vmem:[#allocation8 + $0x30] sm:$0xff]  ;;  %v176_v43 = vld [vmem:[#allocation8 + $0x28] sm:$0xff] }
  0x22   :  { %116 = vmatpush.msra.mxu0 %v97_v12  ;;  %v175_v44 = vld [vmem:[#allocation8 + $0x20] sm:$0xff]  ;;  %v174_v45 = vld [vmem:[#allocation8 + $0x18] sm:$0xff]  ;;  %v173_v50 = vld [vmem:[#allocation8 + $0x10] sm:$0xff] }
  0x23   :  { %157 = vmatpush.msra.mxu1 %v138_v17  ;;  %193 = vmatpush.msra.mxu2 %v184_v35  ;;  %v239_v46 = vld [vmem:[%s443_s2] ss:$0 sm:$0xff]  ;;  %v172_v51 = vld [vmem:[#allocation8 + $0x8] sm:$0xff]  ;;  %v171_v52 = vld [vmem:[#allocation8] sm:$0xff] }
  0x24   :  { %117 = vmatpush.msra.mxu0 %v96_v14  ;;  %v240_v53 = vld [vmem:[%s445_s4] ss:$0 sm:$0xff] }
  0x25   :  { %158 = vmatpush.msra.mxu1 %v137_v19  ;;  %194 = vmatpush.msra.mxu2 %v183_v36  ;;  %v241_v57 = vld [vmem:[%s447_s6] ss:$0 sm:$0xff] }
  0x26   :  { %118 = vmatpush.msra.mxu0 %v95_v16 }
  0x27   :  { %159 = vmatpush.msra.mxu1 %v136_v21  ;;  %195 = vmatpush.msra.mxu2 %v182_v37 }
  0x28   :  { %119 = vmatpush.msra.mxu0 %v94_v18 }
  0x29   :  { %160 = vmatpush.msra.mxu1 %v135_v23  ;;  %196 = vmatpush.msra.mxu2 %v181_v38 }
  0x2a   :  { %120 = vmatpush.msra.mxu0 %v93_v20 }
  0x2b   :  { %161 = vmatpush.msra.mxu1 %v134_v25  ;;  %197 = vmatpush.msra.mxu2 %v180_v39 }
  0x2c   :  { %121 = vmatpush.msra.mxu0 %v92_v22 }
  0x2d   :  { %162 = vmatpush.msra.mxu1 %v133_v27  ;;  %198 = vmatpush.msra.mxu2 %v179_v40 }
  0x2e   :  { %122 = vmatpush.msra.mxu0 %v91_v24 }
  0x2f   :  { %163 = vmatpush.msra.mxu1 %v132_v30  ;;  %199 = vmatpush.msra.mxu2 %v178_v41 }
  0x30   :  { %123 = vmatpush.msra.mxu0 %v90_v26 }
  0x31   :  { %164 = vmatpush.msra.mxu1 %v131_v31  ;;  %200 = vmatpush.msra.mxu2 %v177_v42 }
  0x32   :  { %124 = vmatpush.msra.mxu0 %v89_v28 }
  0x33   :  { %125 = vmatmul.f32.vlgmr.msra.gmra.mxu0 %v88_v29  ;;  %165 = vmatpush.msra.mxu1 %v130_v32 }
  0x34   :  { %201 = vmatpush.msra.mxu2 %v176_v43 }
  0x36   :  { %202 = vmatpush.msra.mxu2 %v175_v44 }
  0x38   :  { %203 = vmatpush.msra.mxu2 %v174_v45 }
  0x3a   :  { %204 = vmatpush.msra.mxu2 %v173_v50 }
  0x3c   :  { %205 = vmatpush.msra.mxu2 %v172_v51 }
  0x3e   :  { %206 = vmatpush.msra.mxu2 %v171_v52 }
  0xb0   :  { %v126_v47 = vpop.f32.mrf.mxu0 }
  0xb1   :  { %v127_v48 = vadd.f32 %v239_v46, %v126_v47 }
  0xb3   :  { %v129_v49 = vmax.f32 %v127_v48, 0.0 }
  0xb5   :  { %166 = vmatmul.f32.vlgmr.msra.gmra.mxu1 %v129_v49 }
 0x132   :  { %v167_v54 = vpop.f32.mrf.mxu1 }
 0x133   :  { %v168_v55 = vadd.f32 %v240_v53, %v167_v54 }
 0x135   :  { %v170_v56 = vmax.f32 %v168_v55, 0.0 }
 0x137   :  { %207 = vmatmul.f32.vlgmr.msra.gmra.mxu2 %v170_v56 }
 0x1ba   :  { %v208_v58 = vpop.f32.mrf.mxu2 }
 0x1bb   :  { %v209_v59 = vadd.f32 %v241_v57, %v208_v58 }
 0x1bd   :  { %v211_v60 = vmax.f32 %v209_v59, 0.0 }
 0x1bf   :  { %212 = vst [vmem:[#allocation10] sm:$0xff] %v211_v60 }
 0x1c0   :  { %223 = dma.vmem_to_hbm [thread:$0]  %s219_s25, 128, %s221_s28, [#allocation4]  }
 0x1c1   :  { %368 = dma.done.wait [#allocation4], 128  }
 0x1c2   :  { %369 = vsyncadd [#allocation4], 4294967168 }
 0x1c3   :  { %228 = vsyncpa [#allocation3], 1 }
 0x1c4   :  { %229 = vsyncpa [#allocation6], 1 }
 0x1c5   :  { %230 = vsyncpa [#allocation9], 1 }
 0x1c6   :  { %231 = vsyncpa [#allocation4], 1 }

</bundles_post_ra>
